<compile_context>
chip_gen: v5e
topology: v5e:2x2
jax: 0.10.0
libtpu: 0.0.40
codegen_flags: <defaults>
</compile_context>

<pallas_src>
import math
import functools

import jax
import jax.numpy as jnp
from jax.experimental import pallas as pl
from jax.experimental.pallas import tpu as pltpu


_TM_CAP = 512  # max rows per output block (x tile second-minor dim)


def _round_up(x, m):
    return ((x + m - 1) // m) * m


@functools.lru_cache(maxsize=None)
def _vmem_capacity_bytes():
    try:
        return int(pltpu.get_tpu_info().vmem_capacity_bytes)
    except Exception:
        return 64 * 2**20  # conservative fallback = v7x per-core VMEM


def _pick_blocks(dim, cap, granule, min_blocks=1):
    """Split `dim` into `n` equal-ish blocks of size <= cap (multiple of
    granule), minimizing padding waste.  Returns (block, padded_dim)."""
    dimp = _round_up(max(dim, 1), granule)
    n = max(min_blocks, -(-dimp // cap))
    blk = _round_up(-(-dimp // n), granule)
    return blk, n * blk


def prepare_linear_params(weight_kc, bias=None, *, tn=None, tk=None, vmem_cap=None):
    """One-time parameter prep (call at module init, NOT per forward):
      * transpose (K, C) -> (C, K) so the kernel uses the canonical
        [tm,tk] @ [tk,tn] MXU contraction,
      * zero-pad to tile multiples so no full-weight HBM->HBM pad copy happens
        per forward call.
    Returns (w_t_padded (Cp, Kp), bias2d (1, Kp) or None, tn, tk)."""
    K, C = weight_kc.shape
    if vmem_cap is None:
        vmem_cap = _vmem_capacity_bytes()
    budget = (3 * vmem_cap) // 4
    isz_w = jnp.dtype(weight_kc.dtype).itemsize

    kp128 = _round_up(K, 128)
    if tn is None:
        # Keep >= 2 output-column blocks whenever K allows it so the j grid
        # axis feeds both v7x TensorCores even when Mp//tm == 1.
        min_j = 2 if kp128 >= 256 else 1
        tn, Kp = _pick_blocks(K, 512, 128, min_blocks=min_j)
    else:
        tn = _round_up(tn, 128)
        Kp = _round_up(K, tn)

    if tk is None:
        # Double-buffered footprint (tm=_TM_CAP worst case) must fit the
        # budget; additionally cap the weight tile at ~8 MiB per pipeline step.
        fixed = 2 * _TM_CAP * tn * 4 + _TM_CAP * tn * 4 + 2 * tn * 4
        per_tk = 2 * (_TM_CAP + tn) * isz_w
        tk_cap = (budget - fixed) // per_tk
        tk_cap = min(tk_cap, (8 * 2**20) // (tn * isz_w))
        tk_cap = max(512, (tk_cap // 128) * 128)
        tk, Cp = _pick_blocks(C, tk_cap, 128)
    else:
        tk = _round_up(tk, 128)
        Cp = _round_up(C, tk)

    w_t = jnp.asarray(weight_kc).T  # (C, K)
    if (Cp, Kp) != (C, K):
        w_t = jnp.pad(w_t, ((0, Cp - C), (0, Kp - K)))

    b2d = None
    if bias is not None:
        b = jnp.asarray(bias)
        if Kp != K:
            b = jnp.pad(b, (0, Kp - K))
        b2d = b.reshape(1, Kp)
    return w_t, b2d, tn, tk


def _linear_kernel(x_ref, w_ref, *rest, has_bias, use_scratch):
    # Ref layout by variant:
    #   has_bias & use_scratch -> (b_ref, o_ref, acc_ref)
    #   has_bias, f32 out      -> (b_ref, o_ref)          acc = o_ref
    #   no bias,  use_scratch  -> (o_ref, acc_ref)
    #   no bias,  f32 out      -> (o_ref,)                acc = o_ref
    if has_bias and use_scratch:
        b_ref, o_ref, acc_ref = rest
    elif has_bias:
        b_ref, o_ref = rest
        acc_ref = o_ref
    elif use_scratch:
        o_ref, acc_ref = rest
        b_ref = None
    else:
        (o_ref,) = rest
        acc_ref = o_ref
        b_ref = None

    k = pl.program_id(2)

    # Canonical [tm,tk] @ [tk,tn] contraction; weight arrives pre-transposed
    # as (C, K), so no per-step relayout/transpose is needed.
    partial = jnp.dot(x_ref[...], w_ref[...], preferred_element_type=jnp.float32)

    @pl.when(k == 0)
    def _():
        acc_ref[...] = partial            # first k-step: direct store, no zero-fill

    @pl.when(k != 0)
    def _():
        acc_ref[...] = acc_ref[...] + partial

    if has_bias or use_scratch:
        @pl.when(k == pl.num_programs(2) - 1)
        def _():
            res = acc_ref[...]
            if has_bias:
                res = res + b_ref[...].astype(res.dtype)  # (1, tn) broadcast
            o_ref[...] = res.astype(o_ref.dtype)


def sparse_linear_forward(x, w_t, bias2d=None, *, tn, tk, valid_k=None, tm=None,
                          out_dtype=None, vmem_limit_bytes=None):
    """y = x @ w_t (+ bias).  `w_t` is the pre-transposed, pre-padded (Cp, Kp)
    weight and `bias2d` the pre-padded (1, Kp) bias from prepare_linear_params.
    Only the activations are padded per call."""
    M, C = x.shape
    Cp, Kp = w_t.shape
    assert C <= Cp and Cp % tk == 0 and Kp % tn == 0, "weight not prepared for these tiles"
    if valid_k is None:
        valid_k = Kp
    if out_dtype is None:
        out_dtype = x.dtype

    isz_x = jnp.dtype(x.dtype).itemsize
    isz_w = jnp.dtype(w_t.dtype).itemsize
    isz_o = jnp.dtype(out_dtype).itemsize

    gran_m = max(8, 32 // isz_x)  # sublane granule: 8 f32 / 16 bf16 / 32 int8
    if tm is None:
        tm, Mp = _pick_blocks(M, _TM_CAP, gran_m)
    else:
        tm = max(gran_m, min(_round_up(tm, gran_m), _round_up(M, gran_m)))
        Mp = _round_up(M, tm)

    # Pad activations only; padded reduction columns hit zero weight rows.
    if (Mp, Cp) != (M, C):
        x = jnp.pad(x, ((0, Mp - M), (0, Cp - C)))

    has_bias = bias2d is not None
    use_scratch = jnp.dtype(out_dtype) != jnp.dtype(jnp.float32)

    args = [x, w_t]
    in_specs = [
        pl.BlockSpec((tm, tk), lambda i, j, k: (i, k)),   # activations (Mp, Cp)
        pl.BlockSpec((tk, tn), lambda i, j, k: (k, j)),   # weight^T    (Cp, Kp)
    ]
    if has_bias:
        args.append(bias2d)
        in_specs.append(pl.BlockSpec((1, tn), lambda i, j, k: (0, j)))

    scratch_shapes = []
    if use_scratch:
        scratch_shapes.append(pltpu.VMEM((tm, tn), jnp.float32))

    # Invariant: reduction axis LAST -> output block index constant across k,
    # which is what makes the resident-output-block accumulation correct.
    grid = (Mp // tm, Kp // tn, Cp // tk)

    vmem_est = (2 * tm * tk * isz_x + 2 * tk * tn * isz_w + 2 * tm * tn * isz_o
                + (tm * tn * 4 if use_scratch else 0)
                + (2 * tn * 4 if has_bias else 0))
    cp_kwargs = dict(dimension_semantics=("parallel", "parallel", "arbitrary"))
    if vmem_limit_bytes is None and vmem_est > 12 * 2**20:
        budget = (3 * _vmem_capacity_bytes()) // 4  # 96 MiB v5e/v6e, 48 MiB v7x
        vmem_limit_bytes = int(min(budget, max(2 * vmem_est, 32 * 2**20)))
    if vmem_limit_bytes is not None:
        cp_kwargs["vmem_limit_bytes"] = int(vmem_limit_bytes)

    kernel = functools.partial(
        _linear_kernel, has_bias=has_bias, use_scratch=use_scratch
    )

    out = pl.pallas_call(
        kernel,
        out_shape=jax.ShapeDtypeStruct((Mp, Kp), out_dtype),
        grid_spec=pltpu.PrefetchScalarGridSpec(
            num_scalar_prefetch=0,
            grid=grid,
            in_specs=in_specs,
            out_specs=pl.BlockSpec((tm, tn), lambda i, j, k: (i, j)),
            scratch_shapes=scratch_shapes,
        ),
        compiler_params=pltpu.CompilerParams(**cp_kwargs),
    )(*args)

    if (Mp, Kp) != (M, valid_k):
        out = out[:M, :valid_k]
    return out


class SparseLinearJAX:
    """Deterministic JAX port of SparseLinear (forward only)."""

    def __init__(self, C, K, bias=True, bk=1, bn=16, name="sparselinear", key=None):
        self.C, self.K, self.bk, self.bn, self.name = C, K, bk, bn, name
        if key is None:
            key = jax.random.PRNGKey(0)
        kw, kb = jax.random.split(key)
        stdv = 1.0 / math.sqrt(C * K)
        # Matches reset_parameters(): uniform(-stdv, +stdv) for all params.
        self.weight = jax.random.uniform(
            kw, (K, C), dtype=jnp.float32, minval=-stdv, maxval=stdv)
        self.bias = (jax.random.uniform(
            kb, (K,), dtype=jnp.float32, minval=-stdv, maxval=stdv)
            if bias else None)
        # One-time transpose + pad (no per-call HBM->HBM weight copy).
        self._w_t, self._bias2d, self._tn, self._tk = prepare_linear_params(
            self.weight, self.bias)

    def __call__(self, x):
        # Dense uniform init -> sparsity == 0 -> dense F.linear path is exact.
        return sparse_linear_forward(
            x, self._w_t, self._bias2d, tn=self._tn, tk=self._tk, valid_k=self.K)


if __name__ == "__main__":
    key = jax.random.PRNGKey(0)
    k_in, k_mod, k_in2, k_w2 = jax.random.split(key, 4)

    # Test 1: module path, small non-tile-aligned shapes, with bias.
    N, C, K = 10, 200, 96
    x = jax.random.normal(k_in, (N, C), dtype=jnp.float32)
    mod = SparseLinearJAX(C, K, bias=True, key=k_mod)
    y = jax.block_until_ready(mod(x))
    y_ref = x @ mod.weight.T + mod.bias
    assert y.shape == (N, K)
    assert jnp.allclose(y, y_ref, atol=1e-4, rtol=1e-4), "mismatch (bias path)"

    # Test 2: forced small tiles -> multi-j / multi-k grid (accumulation path),
    # no-bias variant (no dummy-bias DMA).
    M2, C2, K2 = 24, 384, 320
    x2 = jax.random.normal(k_in2, (M2, C2), dtype=jnp.float32)
    w2 = jax.random.normal(k_w2, (K2, C2), dtype=jnp.float32) * 0.01
    w2_t, _, tn2, tk2 = prepare_linear_params(w2, None, tn=128, tk=128)
    y2 = jax.block_until_ready(
        sparse_linear_forward(x2, w2_t, None, tn=tn2, tk=tk2, valid_k=K2))
    y2_ref = jnp.dot(x2, w2.T, precision=jax.lax.Precision.HIGHEST)
    assert y2.shape == (M2, K2)
    assert jnp.allclose(y2, y2_ref, atol=2e-3, rtol=2e-3), "mismatch (no-bias path)"

    print("KERNEL_OK")
</pallas_src>

<mosaic_0001>
module attributes {stable_mosaic.version = 11 : i64} {
  func.func @_linear_kernel(%arg0: i32, %arg1: i32, %arg2: i32, %arg3: memref<16x256xf32, #tpu.memory_space<vmem>>, %arg4: memref<256x128xf32, #tpu.memory_space<vmem>>, %arg5: memref<1x128xf32, #tpu.memory_space<vmem>>, %arg6: memref<16x128xf32, #tpu.memory_space<vmem>>) attributes {dimension_semantics = [#tpu.dimension_semantics<parallel>, #tpu.dimension_semantics<parallel>, #tpu.dimension_semantics<arbitrary>], iteration_bounds = array<i64: 1, 1, 1>, scalar_prefetch = 0 : i64, scratch_operands = 0 : i64, tpu.core_type = #tpu.core_type<tc>, window_params = [{transform_indices = @transform_0, window_bounds = array<i64: 16, 256>}, {transform_indices = @transform_1, window_bounds = array<i64: 256, 128>}, {transform_indices = @transform_2, window_bounds = array<i64: 1, 128>}, {transform_indices = @transform_3, window_bounds = array<i64: 16, 128>}]} {
    %c0 = arith.constant 0 : index
    %c0_0 = arith.constant 0 : index
    %0 = vector.load %arg3[%c0, %c0_0] : memref<16x256xf32, #tpu.memory_space<vmem>>, vector<16x256xf32>
    %c0_1 = arith.constant 0 : index
    %c0_2 = arith.constant 0 : index
    %1 = vector.load %arg4[%c0_1, %c0_2] : memref<256x128xf32, #tpu.memory_space<vmem>>, vector<256x128xf32>
    %cst = arith.constant dense<0.000000e+00> : vector<16x128xf32>
    %2 = tpu.matmul %0, %1, %cst {dimension_numbers = #tpu.dot_dimension_numbers<[1], [0], [0], [1], [0, 0, 1, 1], [], []>} : vector<16x256xf32>, vector<256x128xf32>, vector<16x128xf32> -> vector<16x128xf32>
    %c0_i32 = arith.constant 0 : i32
    %3 = arith.cmpi eq, %arg2, %c0_i32 : i32
    %4 = arith.extui %3 : i1 to i32
    %c0_i32_3 = arith.constant 0 : i32
    %5 = arith.cmpi ne, %4, %c0_i32_3 : i32
    scf.if %5 {
      %c0_8 = arith.constant 0 : index
      %c0_9 = arith.constant 0 : index
      %12 = vector.load %arg6[%c0_8, %c0_9] : memref<16x128xf32, #tpu.memory_space<vmem>>, vector<16x128xf32>
      tpu.vector_store %arg6[%c0_8, %c0_9], %2 {strides = array<i32>} : memref<16x128xf32, #tpu.memory_space<vmem>>, vector<16x128xf32>,
    } else {
    }
    %c0_i32_4 = arith.constant 0 : i32
    %6 = arith.cmpi ne, %arg2, %c0_i32_4 : i32
    %7 = arith.extui %6 : i1 to i32
    %c0_i32_5 = arith.constant 0 : i32
    %8 = arith.cmpi ne, %7, %c0_i32_5 : i32
    scf.if %8 {
      %c0_8 = arith.constant 0 : index
      %c0_9 = arith.constant 0 : index
      %12 = vector.load %arg6[%c0_8, %c0_9] : memref<16x128xf32, #tpu.memory_space<vmem>>, vector<16x128xf32>
      %13 = arith.addf %12, %2 : vector<16x128xf32>
      %c0_10 = arith.constant 0 : index
      %c0_11 = arith.constant 0 : index
      %14 = vector.load %arg6[%c0_10, %c0_11] : memref<16x128xf32, #tpu.memory_space<vmem>>, vector<16x128xf32>
      tpu.vector_store %arg6[%c0_10, %c0_11], %13 {strides = array<i32>} : memref<16x128xf32, #tpu.memory_space<vmem>>, vector<16x128xf32>,
    } else {
    }
    %c0_i32_6 = arith.constant 0 : i32
    %9 = arith.cmpi eq, %arg2, %c0_i32_6 : i32
    %10 = arith.extui %9 : i1 to i32
    %c0_i32_7 = arith.constant 0 : i32
    %11 = arith.cmpi ne, %10, %c0_i32_7 : i32
    scf.if %11 {
      %c0_8 = arith.constant 0 : index
      %c0_9 = arith.constant 0 : index
      %12 = vector.load %arg6[%c0_8, %c0_9] : memref<16x128xf32, #tpu.memory_space<vmem>>, vector<16x128xf32>
      %c0_10 = arith.constant 0 : index
      %c0_11 = arith.constant 0 : index
      %13 = vector.load %arg5[%c0_10, %c0_11] : memref<1x128xf32, #tpu.memory_space<vmem>>, vector<1x128xf32>
      %14 = vector.broadcast %13 : vector<1x128xf32> to vector<16x128xf32>
      %15 = arith.addf %12, %14 : vector<16x128xf32>
      %c0_12 = arith.constant 0 : index
      %c0_13 = arith.constant 0 : index
      %16 = vector.load %arg6[%c0_12, %c0_13] : memref<16x128xf32, #tpu.memory_space<vmem>>, vector<16x128xf32>
      tpu.vector_store %arg6[%c0_12, %c0_13], %15 {strides = array<i32>} : memref<16x128xf32, #tpu.memory_space<vmem>>, vector<16x128xf32>,
    } else {
    }
    return
  }
  func.func @transform_0(%arg0: i32, %arg1: i32, %arg2: i32) -> (i32, i32) {
    %c0_i32 = arith.constant 0 : i32
    return %arg0, %arg2 : i32, i32
  }
  func.func @transform_1(%arg0: i32, %arg1: i32, %arg2: i32) -> (i32, i32) {
    %c0_i32 = arith.constant 0 : i32
    return %arg2, %arg1 : i32, i32
  }
  func.func @transform_2(%arg0: i32, %arg1: i32, %arg2: i32) -> (i32, i32) {
    %c0_i32 = arith.constant 0 : i32
    %c0_i32_0 = arith.constant 0 : i32
    return %c0_i32, %arg1 : i32, i32
  }
  func.func @transform_3(%arg0: i32, %arg1: i32, %arg2: i32) -> (i32, i32) {
    %c0_i32 = arith.constant 0 : i32
    return %arg0, %arg1 : i32, i32
  }
}

</mosaic_0001>

<bundles_post_ra>
// kernel: tpu_custom_call.1
= control target key start
LH: loop header
LB: loop body
LE: loop exit
PB: predicated region body
PF: predicated region fallthrough
CT: control target
= control target key end

     0   :  { %8 = vsyncpa [#allocation3], 0  ;;  %s341_s0 = inlined_call_operand.hbm [shape: f32[16,256], index: 0, kind: input, shape index: {}]   ;;  %s342_s1 = inlined_call_operand.hbm [shape: f32[256,128], index: 1, kind: input, shape index: {}]   ;;  %s343_s2 = inlined_call_operand.vmem [shape: f32[1,128], index: 2, kind: input, shape index: {}]   ;;  %s344_s3 = inlined_call_operand.hbm [shape: f32[16,128], index: 3, kind: output, shape index: {}]  }
   0x1   :  { %9 = vsyncpa [#allocation6], 0 }
   0x2   :  { %10 = vsyncpa [#allocation4], 0  ;;  %s15_s14 = sshll.u32 %s341_s0, 4  ;;  %s296_s15 = smov [#allocation2]   ;;  %s16_s14 = int_to_ptr.hbm [resolvable:$true] %s15_s14 }
   0x3   :  { %s17_s16 = sshll.u32 %s296_s15, 4  ;;  %s28_s19 = sshll.u32 %s342_s1, 4  ;;  %s18_s16 = int_to_ptr.vmem [resolvable:$true] %s17_s16  ;;  %s29_s19 = int_to_ptr.hbm [resolvable:$true] %s28_s19 }
   0x4   :  { %s297_s20 = smov 256   ;;  %s298_s21 = smov 16  }
   0x5   :  { %23 = dma.hbm_to_vmem [thread:$0]  %s16_s14, 512, %s18_s16, [#allocation3], %s297_s20, %s297_s20, %s298_s21  }
   0x6   :  { %s299_s22 = smov [#allocation5]   ;;  %s300_s24 = smov 128  }
   0x7   :  { %s30_s23 = sshll.u32 %s299_s22, 4  ;;  %s301_s25 = smov 8   ;;  %s31_s23 = int_to_ptr.vmem [resolvable:$true] %s30_s23 }
   0x8   :  { %36 = dma.hbm_to_vmem [thread:$0]  %s29_s19, 4096, %s31_s23, [#allocation6], %s300_s24, %s300_s24, %s301_s25  }
   0x9   :  { %290 = dma.done.wait [#allocation3], 512  }
   0xa   :  { %291 = vsyncadd [#allocation3], 4294966784 }
   0xb   :  { %292 = dma.done.wait [#allocation6], 4096  }
   0xc   :  { %293 = vsyncadd [#allocation6], 4294963200  ;;  %v66_v0 = vld [vmem:[#allocation5 + $0x78] sm:$0xff]  ;;  %v65_v2 = vld [vmem:[#allocation5 + $0x70] sm:$0xff]  ;;  %s302_s26 = smov [#allocation7]   ;;  %s164_s30 = sshll.u32 %s344_s3, 4  ;;  %s165_s30 = int_to_ptr.hbm [resolvable:$true] %s164_s30 }
   0xd   :  { %v82_v1 = vld [vmem:[#allocation5 + $0xf8] sm:$0xff]  ;;  %178 = vmatpush.msra.mxu2 %v66_v0  ;;  %v81_v3 = vld [vmem:[#allocation5 + $0xf0] sm:$0xff]  ;;  %v64_v4 = vld [vmem:[#allocation5 + $0x68] sm:$0xff]  ;;  %83 = vmatpush.msra.mxu0 %v66_v0  ;;  %s162_s27 = sshll.u32 %s302_s26, 4  ;;  %s163_s27 = int_to_ptr.vmem [resolvable:$true] %s162_s27 }
   0xe   :  { %194 = vmatpush.msra.mxu3 %v82_v1  ;;  %v80_v5 = vld [vmem:[#allocation5 + $0xe8] sm:$0xff]  ;;  %106 = vmatpush.msra.mxu1 %v82_v1  ;;  %v63_v6 = vld [vmem:[#allocation5 + $0x60] sm:$0xff]  ;;  %v62_v8 = vld [vmem:[#allocation5 + $0x58] sm:$0xff] }
   0xf   :  { %179 = vmatpush.msra.mxu2 %v65_v2  ;;  %v79_v7 = vld [vmem:[#allocation5 + $0xe0] sm:$0xff]  ;;  %84 = vmatpush.msra.mxu0 %v65_v2  ;;  %v78_v9 = vld [vmem:[#allocation5 + $0xd8] sm:$0xff]  ;;  %v61_v10 = vld [vmem:[#allocation5 + $0x50] sm:$0xff] }
  0x10   :  { %195 = vmatpush.msra.mxu3 %v81_v3  ;;  %107 = vmatpush.msra.mxu1 %v81_v3  ;;  %v77_v11 = vld [vmem:[#allocation5 + $0xd0] sm:$0xff]  ;;  %v60_v12 = vld [vmem:[#allocation5 + $0x48] sm:$0xff]  ;;  %v59_v14 = vld [vmem:[#allocation5 + $0x40] sm:$0xff] }
  0x11   :  { %180 = vmatpush.msra.mxu2 %v64_v4  ;;  %85 = vmatpush.msra.mxu0 %v64_v4  ;;  %v76_v13 = vld [vmem:[#allocation5 + $0xc8] sm:$0xff]  ;;  %v75_v15 = vld [vmem:[#allocation5 + $0xc0] sm:$0xff]  ;;  %v58_v16 = vld [vmem:[#allocation5 + $0x38] sm:$0xff] }
  0x12   :  { %196 = vmatpush.msra.mxu3 %v80_v5  ;;  %108 = vmatpush.msra.mxu1 %v80_v5  ;;  %v74_v17 = vld [vmem:[#allocation5 + $0xb8] sm:$0xff]  ;;  %v57_v18 = vld [vmem:[#allocation5 + $0x30] sm:$0xff]  ;;  %v56_v20 = vld [vmem:[#allocation5 + $0x28] sm:$0xff] }
  0x13   :  { %181 = vmatpush.msra.mxu2 %v63_v6  ;;  %86 = vmatpush.msra.mxu0 %v63_v6  ;;  %v73_v19 = vld [vmem:[#allocation5 + $0xb0] sm:$0xff]  ;;  %v72_v21 = vld [vmem:[#allocation5 + $0xa8] sm:$0xff]  ;;  %v55_v22 = vld [vmem:[#allocation5 + $0x20] sm:$0xff] }
  0x14   :  { %197 = vmatpush.msra.mxu3 %v79_v7  ;;  %109 = vmatpush.msra.mxu1 %v79_v7  ;;  %v71_v23 = vld [vmem:[#allocation5 + $0xa0] sm:$0xff]  ;;  %v54_v24 = vld [vmem:[#allocation5 + $0x18] sm:$0xff]  ;;  %v53_v26 = vld [vmem:[#allocation5 + $0x10] sm:$0xff] }
  0x15   :  { %182 = vmatpush.msra.mxu2 %v62_v8  ;;  %87 = vmatpush.msra.mxu0 %v62_v8  ;;  %v70_v25 = vld [vmem:[#allocation5 + $0x98] sm:$0xff]  ;;  %v69_v27 = vld [vmem:[#allocation5 + $0x90] sm:$0xff]  ;;  %v52_v28 = vld [vmem:[#allocation5 + $0x8] sm:$0xff] }
  0x16   :  { %198 = vmatpush.msra.mxu3 %v78_v9  ;;  %110 = vmatpush.msra.mxu1 %v78_v9  ;;  %v68_v29 = vld [vmem:[#allocation5 + $0x88] sm:$0xff]  ;;  %v51_v30 = vld [vmem:[#allocation5] sm:$0xff]  ;;  %v49_v32 = vld [vmem:[#allocation2 + $0x10] sm:$0xff] }
  0x17   :  { %183 = vmatpush.msra.mxu2 %v61_v10  ;;  %88 = vmatpush.msra.mxu0 %v61_v10  ;;  %v67_v31 = vld [vmem:[#allocation5 + $0x80] sm:$0xff]  ;;  %v50_v33 = vld [vmem:[#allocation2 + $0x18] sm:$0xff]  ;;  %v48_v35 = vld [vmem:[#allocation2 + $0x8] sm:$0xff] }
  0x18   :  { %199 = vmatpush.msra.mxu3 %v77_v11  ;;  %111 = vmatpush.msra.mxu1 %v77_v11  ;;  %v47_v34 = vld [vmem:[#allocation2] sm:$0xff] }
  0x19   :  { %184 = vmatpush.msra.mxu2 %v60_v12  ;;  %89 = vmatpush.msra.mxu0 %v60_v12  ;;  %v217_v36 = vld [vmem:[%s343_s2] ss:$0 sm:$0xff] }
  0x1a   :  { %200 = vmatpush.msra.mxu3 %v76_v13  ;;  %112 = vmatpush.msra.mxu1 %v76_v13 }
  0x1b   :  { %185 = vmatpush.msra.mxu2 %v59_v14  ;;  %90 = vmatpush.msra.mxu0 %v59_v14 }
  0x1c   :  { %201 = vmatpush.msra.mxu3 %v75_v15  ;;  %113 = vmatpush.msra.mxu1 %v75_v15 }
  0x1d   :  { %186 = vmatpush.msra.mxu2 %v58_v16  ;;  %91 = vmatpush.msra.mxu0 %v58_v16 }
  0x1e   :  { %202 = vmatpush.msra.mxu3 %v74_v17  ;;  %114 = vmatpush.msra.mxu1 %v74_v17 }
  0x1f   :  { %187 = vmatpush.msra.mxu2 %v57_v18  ;;  %92 = vmatpush.msra.mxu0 %v57_v18 }
  0x20   :  { %203 = vmatpush.msra.mxu3 %v73_v19  ;;  %115 = vmatpush.msra.mxu1 %v73_v19 }
  0x21   :  { %188 = vmatpush.msra.mxu2 %v56_v20  ;;  %93 = vmatpush.msra.mxu0 %v56_v20 }
  0x22   :  { %204 = vmatpush.msra.mxu3 %v72_v21  ;;  %116 = vmatpush.msra.mxu1 %v72_v21 }
  0x23   :  { %189 = vmatpush.msra.mxu2 %v55_v22  ;;  %94 = vmatpush.msra.mxu0 %v55_v22 }
  0x24   :  { %205 = vmatpush.msra.mxu3 %v71_v23  ;;  %117 = vmatpush.msra.mxu1 %v71_v23 }
  0x25   :  { %190 = vmatpush.msra.mxu2 %v54_v24  ;;  %95 = vmatpush.msra.mxu0 %v54_v24 }
  0x26   :  { %206 = vmatpush.msra.mxu3 %v70_v25  ;;  %118 = vmatpush.msra.mxu1 %v70_v25 }
  0x27   :  { %191 = vmatpush.msra.mxu2 %v53_v26  ;;  %96 = vmatpush.msra.mxu0 %v53_v26 }
  0x28   :  { %207 = vmatpush.msra.mxu3 %v69_v27  ;;  %119 = vmatpush.msra.mxu1 %v69_v27 }
  0x29   :  { %192 = vmatpush.msra.mxu2 %v52_v28  ;;  %97 = vmatpush.msra.mxu0 %v52_v28 }
  0x2a   :  { %208 = vmatpush.msra.mxu3 %v68_v29  ;;  %120 = vmatpush.msra.mxu1 %v68_v29 }
  0x2b   :  { %193 = vmatpush.msra.mxu2 %v51_v30  ;;  %98 = vmatpush.msra.mxu0 %v51_v30 }
  0x2c   :  { %209 = vmatpush.msra.mxu3 %v67_v31  ;;  %102 = vmatmul.f32.vlgmr.msra.gmra.mxu2 %v49_v32 }
  0x2d   :  { %125 = vmatmul.f32.vlgmr.msra.gmra.mxu3 %v50_v33  ;;  %121 = vmatpush.msra.mxu1 %v67_v31 }
  0x2e   :  { %99 = vmatmul.f32.vlgmr.msra.gmra.mxu0 %v47_v34  ;;  %122 = vmatmul.f32.vlgmr.msra.gmra.mxu1 %v48_v35 }
  0xab   :  { %v100_v37 = vpop.f32.mrf.mxu0  ;;  %v123_v38 = vpop.f32.mrf.mxu1 }
  0xac   :  { %v124_v39 = vadd.f32 %v123_v38, %v100_v37 }
  0xae   :  { %v154_v40 = vadd.f32 %v217_v36, %v124_v39 }
  0xaf   :  { %v103_v41 = vpop.f32.mrf.mxu2 }
  0xb0   :  { %v126_v42 = vpop.f32.mrf.mxu3  ;;  %156 = vst [vmem:[#allocation7] sm:$0xff] %v154_v40 }
  0xb1   :  { %v127_v43 = vadd.f32 %v126_v42, %v103_v41 }
  0xb3   :  { %v155_v44 = vadd.f32 %v217_v36, %v127_v43 }
  0xb5   :  { %157 = vst [vmem:[#allocation7 + $0x8] sm:$0xff] %v155_v44 }
  0xb6   :  { %170 = dma.vmem_to_hbm [thread:$0]  %s163_s27, 256, %s165_s30, [#allocation4], %s300_s24, %s300_s24, %s301_s25  }
  0xb7   :  { %294 = dma.done.wait [#allocation4], 256  }
  0xb8   :  { %295 = vsyncadd [#allocation4], 4294967040 }
  0xb9   :  { %175 = vsyncpa [#allocation3], 1 }
  0xba   :  { %176 = vsyncpa [#allocation6], 1 }
  0xbb   :  { %177 = vsyncpa [#allocation4], 1 }

</bundles_post_ra>
